<compile_context>
chip_gen: v6e
topology: v6e:2x2x1
jax: 0.10.0
libtpu: 0.0.40
codegen_flags: <defaults>
</compile_context>

<pallas_src>
import jax
import jax.numpy as jnp
from jax.experimental import pallas as pl
from jax.experimental.pallas import tpu as pltpu


def _round_up(x: int, m: int) -> int:
    return ((x + m - 1) // m) * m


def _embed_kernel(patch_ref, w_ref, pos_ref, out_ref):
    # patch_ref: (1, TN, Kp)  bf16  -- one batch element, one N-tile of patches
    # w_ref:     (Kp, D)      bf16  -- grid-invariant projection weight
    # pos_ref:   (TN, D)      f32/bf16 -- position embedding tile (+ conv bias)
    # out_ref:   (1, TN, D)   out dtype
    acc = jnp.dot(patch_ref[0], w_ref[...],
                  preferred_element_type=jnp.float32)          # MXU, f32 acc
    out_ref[0] = (acc + pos_ref[...].astype(jnp.float32)).astype(out_ref.dtype)


def siglip_vision_embeddings(pixel_values, conv_weight, conv_bias, pos_embedding,
                             patch_size, *, out_dtype=None):
    """
    pixel_values : (B, C, H, W)  float32   (NCHW, like PyTorch)
    conv_weight  : (D, C, P, P)  float32   (PyTorch Conv2d weight layout)
    conv_bias    : (D,)          float32
    pos_embedding: (N, D)        float32   (nn.Embedding weight, N = num_patches)
    out_dtype    : optional output dtype (e.g. jnp.bfloat16 for inference);
                   defaults to pixel_values.dtype.
    returns      : (B, N, D)
    """
    B, C, H, W = pixel_values.shape
    D = conv_weight.shape[0]
    P = patch_size
    nh, nw = H // P, W // P
    N = nh * nw
    K = C * P * P
    out_dtype = pixel_values.dtype if out_dtype is None else out_dtype
    # Keep the epilogue table in f32 unless the consumer wants bf16 outputs.
    pos_dtype = jnp.bfloat16 if out_dtype == jnp.bfloat16 else jnp.float32

    # ---- tiling: N padded to a multiple of 16, K padded to a multiple of 128 ----
    n16 = _round_up(N, 16)
    TN = min(128, n16)                 # 128: MXU-friendly on all gens, >=2 steps
    N_pad = _round_up(n16, TN)         # multiple of TN (and of 16)
    n_tiles = N_pad // TN
    K_pad = _round_up(K, 128)

    # ---- glue: patchify pixel input (layout only, no compute), bf16 for MXU ----
    # (B, C, nh, P, nw, P) -> (B, nh, nw, C, P, P) -> (B, N, K)
    x = pixel_values.astype(jnp.bfloat16).reshape(B, C, nh, P, nw, P)
    x = jnp.transpose(x, (0, 2, 4, 1, 3, 5))
    patches = x.reshape(B, N, K)
    if (N_pad != N) or (K_pad != K):
        patches = jnp.pad(patches, ((0, 0), (0, N_pad - N), (0, K_pad - K)))

    # Conv weight (D, C, P, P) -> (K, D) so patch @ W == conv output channel dot;
    # zero-pad contraction dim to K_pad (mathematically inert).
    w = conv_weight.reshape(D, K).T.astype(jnp.bfloat16)                # (K, D)
    if K_pad != K:
        w = jnp.pad(w, ((0, K_pad - K), (0, 0)))

    # Fold conv bias into the position embedding (one host-side add).
    pos_plus_bias = (pos_embedding.astype(jnp.float32)
                     + conv_bias[None, :].astype(jnp.float32)).astype(pos_dtype)
    if N_pad != N:
        pos_plus_bias = jnp.pad(pos_plus_bias, ((0, N_pad - N), (0, 0)))

    # ---- Pallas kernel: bf16 matmul (f32 acc) + pos/bias epilogue ----
    # Grid order (n_tiles, B) with B innermost: the pos tile's block index only
    # changes when the N-tile changes, so it is DMA'd once per N-tile, not per
    # (n, b). The constant-index weight is DMA'd exactly once.
    out = pl.pallas_call(
        _embed_kernel,
        out_shape=jax.ShapeDtypeStruct((B, N_pad, D), out_dtype),
        grid_spec=pltpu.PrefetchScalarGridSpec(
            num_scalar_prefetch=0,
            grid=(n_tiles, B),
            in_specs=[
                pl.BlockSpec((1, TN, K_pad), lambda n, b: (b, n, 0)),  # patches
                pl.BlockSpec((K_pad, D), lambda n, b: (0, 0)),         # weight
                pl.BlockSpec((TN, D), lambda n, b: (n, 0)),            # pos+bias
            ],
            out_specs=pl.BlockSpec((1, TN, D), lambda n, b: (b, n, 0)),
        ),
        compiler_params=pltpu.CompilerParams(
            dimension_semantics=("parallel", "parallel"),
            vmem_limit_bytes=32 * 1024 * 1024),
    )(patches, w, pos_plus_bias)

    return out[:, :N, :]


def _reference(pixel_values, conv_weight, conv_bias, pos_embedding, patch_size):
    """Pure-JAX f32 reference mirroring the PyTorch forward."""
    P = patch_size
    patch_embeds = jax.lax.conv_general_dilated(
        pixel_values, conv_weight,
        window_strides=(P, P), padding="VALID",
        dimension_numbers=("NCHW", "OIHW", "NCHW"),
    ) + conv_bias[None, :, None, None]                       # (B, D, nh, nw)
    B, D = patch_embeds.shape[0], patch_embeds.shape[1]
    emb = patch_embeds.reshape(B, D, -1).transpose(0, 2, 1)  # (B, N, D)
    return emb + pos_embedding[None]


if __name__ == "__main__":
    # Small config consistent with the module:
    #   num_channels=4, image_size=16, patch_size=8, hidden_size=128
    #   -> num_patches = (16 // 8)**2 = 4, K = 4*8*8 = 256
    B, C, H, W = 2, 4, 16, 16
    P = 8
    D = 128
    N = (H // P) * (W // P)

    key = jax.random.PRNGKey(0)
    k_pix, k_w, k_b, k_pos = jax.random.split(key, 4)

    pixel_values = jax.random.normal(k_pix, (B, C, H, W), dtype=jnp.float32)
    conv_weight = jax.random.normal(k_w, (D, C, P, P), dtype=jnp.float32) * 0.02
    conv_bias = jax.random.normal(k_b, (D,), dtype=jnp.float32) * 0.02
    pos_embedding = jax.random.normal(k_pos, (N, D), dtype=jnp.float32) * 0.02

    out = siglip_vision_embeddings(pixel_values, conv_weight, conv_bias,
                                   pos_embedding, P)
    out = jax.block_until_ready(out)

    ref = _reference(pixel_values, conv_weight, conv_bias, pos_embedding, P)
    assert out.shape == (B, N, D), out.shape
    # bf16 MXU inputs (f32 accumulation) -> relaxed tolerance vs the f32 reference.
    assert jnp.allclose(out, ref, atol=2e-2, rtol=2e-2), "mismatch vs reference"

    print("KERNEL_OK")
</pallas_src>

<mosaic_0001>
module attributes {stable_mosaic.version = 11 : i64} {
  func.func @_embed_kernel(%arg0: i32, %arg1: i32, %arg2: memref<1x16x256xbf16, #tpu.memory_space<vmem>>, %arg3: memref<256x128xbf16, #tpu.memory_space<vmem>>, %arg4: memref<16x128xf32, #tpu.memory_space<vmem>>, %arg5: memref<1x16x128xf32, #tpu.memory_space<vmem>>) attributes {dimension_semantics = [#tpu.dimension_semantics<parallel>, #tpu.dimension_semantics<parallel>], iteration_bounds = array<i64: 1, 2>, scalar_prefetch = 0 : i64, scratch_operands = 0 : i64, tpu.core_type = #tpu.core_type<tc>, window_params = [{transform_indices = @transform_0, window_bounds = array<i64: 1, 16, 256>}, {pipeline_mode = #tpu.pipeline_mode<synchronous>, transform_indices = @transform_1, window_bounds = array<i64: 256, 128>}, {transform_indices = @transform_2, window_bounds = array<i64: 16, 128>}, {transform_indices = @transform_3, window_bounds = array<i64: 1, 16, 128>}]} {
    %c0 = arith.constant 0 : index
    %c0_0 = arith.constant 0 : index
    %c0_1 = arith.constant 0 : index
    %0 = vector.load %arg2[%c0, %c0_0, %c0_1] : memref<1x16x256xbf16, #tpu.memory_space<vmem>>, vector<1x16x256xbf16>
    %1 = vector.shape_cast %0 : vector<1x16x256xbf16> to vector<16x256xbf16>
    %c0_2 = arith.constant 0 : index
    %c0_3 = arith.constant 0 : index
    %2 = vector.load %arg3[%c0_2, %c0_3] : memref<256x128xbf16, #tpu.memory_space<vmem>>, vector<256x128xbf16>
    %cst = arith.constant dense<0.000000e+00> : vector<16x128xf32>
    %3 = tpu.matmul %1, %2, %cst {dimension_numbers = #tpu.dot_dimension_numbers<[1], [0], [0], [1], [0, 0, 1, 1], [], []>} : vector<16x256xbf16>, vector<256x128xbf16>, vector<16x128xf32> -> vector<16x128xf32>
    %c0_4 = arith.constant 0 : index
    %c0_5 = arith.constant 0 : index
    %4 = vector.load %arg4[%c0_4, %c0_5] : memref<16x128xf32, #tpu.memory_space<vmem>>, vector<16x128xf32>
    %5 = arith.addf %3, %4 : vector<16x128xf32>
    %c0_6 = arith.constant 0 : index
    %c0_7 = arith.constant 0 : index
    %c0_8 = arith.constant 0 : index
    %6 = vector.load %arg5[%c0_6, %c0_7, %c0_8] : memref<1x16x128xf32, #tpu.memory_space<vmem>>, vector<1x16x128xf32>
    %7 = vector.shape_cast %6 : vector<1x16x128xf32> to vector<16x128xf32>
    %8 = vector.shape_cast %5 : vector<16x128xf32> to vector<1x16x128xf32>
    tpu.vector_store %arg5[%c0_6, %c0_7, %c0_8], %8 {strides = array<i32>} : memref<1x16x128xf32, #tpu.memory_space<vmem>>, vector<1x16x128xf32>,
    return
  }
  func.func @transform_0(%arg0: i32, %arg1: i32) -> (i32, i32, i32) {
    %c0_i32 = arith.constant 0 : i32
    %c0_i32_0 = arith.constant 0 : i32
    return %arg1, %arg0, %c0_i32 : i32, i32, i32
  }
  func.func @transform_1(%arg0: i32, %arg1: i32) -> (i32, i32) {
    %c0_i32 = arith.constant 0 : i32
    %c0_i32_0 = arith.constant 0 : i32
    %c0_i32_1 = arith.constant 0 : i32
    return %c0_i32, %c0_i32_0 : i32, i32
  }
  func.func @transform_2(%arg0: i32, %arg1: i32) -> (i32, i32) {
    %c0_i32 = arith.constant 0 : i32
    %c0_i32_0 = arith.constant 0 : i32
    return %arg0, %c0_i32 : i32, i32
  }
  func.func @transform_3(%arg0: i32, %arg1: i32) -> (i32, i32, i32) {
    %c0_i32 = arith.constant 0 : i32
    %c0_i32_0 = arith.constant 0 : i32
    return %arg1, %arg0, %c0_i32 : i32, i32, i32
  }
}

</mosaic_0001>

<bundles_post_ra>
// kernel: tpu_custom_call.1
= control target key start
LH: loop header
LB: loop body
LE: loop exit
PB: predicated region body
PF: predicated region fallthrough
CT: control target
= control target key end

     0   :  { %8 = vsyncpa [#allocation3], 0  ;;  %s1125_s0 = inlined_call_operand.hbm [shape: bf16[2,16,256], index: 0, kind: input, shape index: {}]   ;;  %s1126_s1 = inlined_call_operand.hbm [shape: bf16[256,128], index: 1, kind: input, shape index: {}]   ;;  %s1127_s2 = inlined_call_operand.hbm [shape: f32[16,128], index: 2, kind: input, shape index: {}]   ;;  %s1128_s3 = inlined_call_operand.hbm [shape: f32[2,16,128], index: 3, kind: output, shape index: {}]  }
   0x1   :  { %10 = vsyncpa [#allocation3 + $0x1], 0 }
   0x2   :  { %11 = vsyncpa [#allocation6], 0 }
   0x3   :  { %12 = vsyncpa [#allocation4], 0 }
   0x4   :  { %14 = vsyncpa [#allocation4 + $0x1], 0  ;;  %s923_s12 = smov 0   ;;  %s925_s13 = smov 0  }
   0x5   :  { %s927_s14 = smov 0   ;;  %s929_s15 = smov 0  }
   0x6   :  { %s931_s16 = smov 0   ;;  %s933_s17 = smov 0  }
   0x7 LB: > { %s558_s18 = sadd.s32 4294967295, %s891_s17   ;;  %s559_s19 = sadd.s32 4294967294, %s891_s17   ;;  %s891_s17 = sphi %s933_s17, %s20_s17   ;;  %s887_s16 = sphi %s931_s16, %s1150_s16   ;;  %s883_s15 = sphi %s929_s15, %s1149_s15   ;;  %s879_s14 = sphi %s927_s14, %s1148_s14   ;;  %s875_s13 = sphi %s925_s13, %s1147_s13   ;;  %s871_s12 = sphi %s923_s12, %s1146_s12  }
   0x8   : > { %p54_p0 = scmp.ne.s32.totalorder %s875_s13, %s871_s12  ;;  %p957_p1 = scmp.eq.s32.totalorder %s558_s18, 0 }
   0x9   : > { %p961_p2 = scmp.eq.s32.totalorder %s558_s18, 1  ;;  %p133_p3 = scmp.eq.s32.totalorder %s559_s19, 1 }
   0xa   : > { %s1133_s20 = scalar_select %p957_p1, 1, 0 }
   0xb   : > { %p967_p4 = por %p957_p1, %p54_p0  ;;  %p560_p5 = scmp.ge.s32.totalorder %s891_s17, 1 }
   0xc   : > { %p972_p6 = por %p133_p3, %p54_p0  ;;  %p140_p7 = scmp.lt.s32.totalorder %s891_s17, 3 }
   0xd   : > { %s1135_s22 = scalar_select %p967_p4, 1, 0 }
   0xe   : > { %s1136_s23 = scalar_select %p972_p6, 1, 0 }
   0xf   : > { %p977_p8 = pnand %p560_p5, %p140_p7  ;;  %s893_s25 = smov [#allocation5]  }
  0x10   : > { %s152_s26 = sshll.u32 %s893_s25, 4  ;;  %s894_s28 = smov [#allocation7]   ;;  %s153_s26 = int_to_ptr.vmem [resolvable:$true] %s152_s26 }
  0x11   : > { %p631_p9 = pneg %p977_p8  ;;  %s168_s29 = sshll.u32 %s894_s28, 4  ;;  %s169_s29 = int_to_ptr.vmem [resolvable:$true] %s168_s29 }
  0x12   : > { %s738_s30 = scalar_lea.vmem %s153_s26, 2048  ;;  %p746_p5 = scmp.lt.s32.totalorder %s153_s26, %s153_s26 }
  0x13   : > { %p986_p11 = pnand %p631_p9, %p957_p1  ;;  %p739_p13 = scmp.ne.s32.totalorder %s153_s26, %s738_s30 }
  0x14   : > { %p747_p7 = scmp.lt.s32.totalorder %s738_s30, %s738_s30 }
  0x15   : > { %p729_p12 = pneg %p986_p11 }
  0x16   : > { %p748_p10 = por %p747_p7, %p746_p5 }
  0x17   : > { %p741_p0 = pnand %p739_p13, %p729_p12 }
  0x19   : > { %p742_p3 = pneg %p741_p0 }
  0x1b   : > { %p749_p9 = pnand %p748_p10, %p742_p3 }
  0x1d   : > { %752 = shalt.err (!%p749_p9)
}
  0x1e   : > { %s895_s4 = smov 64   ;;  %s896_s5 = smov 4  }
  0x1f   : > { %634 = dma.hbm_to_vmem [thread:$0]  (!%p986_p11), %s1126_s1, 2048, %s153_s26, [#allocation6], %s895_s4, %s895_s4, %s896_s5  }
  0x20   : > { %s764_s8 = scalar_lea.vmem %s169_s29, 256  ;;  %p772_p1 = scmp.lt.s32.totalorder %s169_s29, %s169_s29 }
  0x21   : > { %p765_p6 = scmp.ne.s32.totalorder %s169_s29, %s764_s8  ;;  %p773_p4 = scmp.lt.s32.totalorder %s764_s8, %s764_s8 }
  0x23   : > { %p767_p13 = pnand %p765_p6, %p729_p12  ;;  %p774_p5 = por %p773_p4, %p772_p1 }
  0x25   : > { %p768_p0 = pneg %p767_p13 }
  0x27   : > { %p775_p10 = pnand %p774_p5, %p768_p0 }
  0x29   : > { %778 = shalt.err (!%p775_p10)
}
  0x2a   : > { %s1132_s9 = smov 128   ;;  %s898_s10 = smov 8  }
  0x2b   : > { %637 = dma.hbm_to_vmem [thread:$0]  (!%p986_p11), %s1127_s2, 256, %s169_s29, [#allocation6], %s1132_s9, %s1132_s9, %s898_s10  }
  0x2c   : > { %s29_s19 = sadd.s32 1, %s887_s16  ;;  %s41_s25 = sadd.s32 1, %s879_s14 }
  0x2d   : > { %p30_p1 = scmp.ge.s32.totalorder %s29_s19, 2  ;;  %p48_p4 = scmp.ne.s32.totalorder %s879_s14, %s875_s13 }
  0x2e   : > { %p49_p6 = scmp.eq.s32.totalorder %s891_s17, 0  ;;  %p648_p12 = scmp.lt.s32.totalorder %s891_s17, 2 }
  0x2f   : > { %s1152_s19 = smov (%p30_p1, %s29_s19), 0  ;;  %p1021_p7 = por %p961_p2, %p48_p4 }
  0x30   : > { %p50_p3 = por %p49_p6, %p48_p4  ;;  %s36_s27 = ssub.s32 %s887_s16, %s1152_s19 }
  0x31   : > { %s182_s28 = sand.u32 1, %s879_s14   ;;  %p39_p9 = scmp.eq.s32.totalorder %s36_s27, 0 }
  0x32   : > { %s564_s29 = sshll.u32 %s182_s28, 4  ;;  %s595_s30 = sshll.u32 %s887_s16, 8 }
  0x33   : > { %s1030_s4 = scalar_select %p39_p9, %s879_s14, %s41_s25  }
  0x34   : > { %s195_s7 = scalar_lea.hbm %s1125_s0, %s595_s30  ;;  %s186_s8 = scalar_lea.vmem [#allocation2], %s564_s29 }
  0x35   : > { %s196_s11 = sshll.u32 %s186_s8, 4  ;;  %p1037_p11 = pnand %p648_p12, %p50_p3  ;;  %s197_s11 = int_to_ptr.vmem [resolvable:$true] %s196_s11 }
  0x36   : > { %s183_s18 = scalar_lea.sflag [#allocation3], %s182_s28  ;;  %s792_s27 = scalar_lea.vmem %s197_s11, 256 }
  0x37   : > { %p781_p2 = pneg %p1037_p11  ;;  %p793_p13 = scmp.ne.s32.totalorder %s197_s11, %s792_s27 }
  0x38   : > { %s899_s25 = smov [#allocation2]  }
  0x39   : > { %p795_p0 = pnand %p793_p13, %p781_p2  ;;  %s797_s9 = sshll.u32 %s899_s25, 4  ;;  %s798_s9 = int_to_ptr.vmem [resolvable:$false] %s797_s9 }
  0x3a   : > { %s799_s30 = scalar_lea.vmem %s798_s9, 512  ;;  %p800_p10 = scmp.lt.s32.totalorder %s197_s11, %s798_s9 }
  0x3b   : > { %p796_p5 = pneg %p795_p0  ;;  %p801_p1 = scmp.lt.s32.totalorder %s799_s30, %s792_s27 }
  0x3d   : > { %p802_p4 = por %p801_p1, %p800_p10 }
  0x3f   : > { %p803_p6 = pnand %p802_p4, %p796_p5 }
  0x41   : > { %806 = shalt.err (!%p803_p6)
}
  0x42   : > { %s1141_s29 = smov 128   ;;  %208 = sbr.rel (%p977_p8) target bundleno = 325 (0x145), region = 32 }
  0x43   : > { %641 = dma.hbm_to_vmem [thread:$0]  (!%p1037_p11), %s195_s7, 256, %s197_s11, %s183_s18, %s1141_s29, %s1141_s29, %s898_s10  }
  0x44   : > { %s1051_s28 = sand.u32 (!%p977_p8), 1, %s875_s13   ;;  %p1142_p12 = scmp.ne.s32.totalorder (!%p977_p8), %s1135_s22, 0 }
  0x45   : > { %s568_s9 = sshll.u32 (!%p977_p8), %s1051_s28, 4  ;;  %s211_s5 = scalar_lea.sflag (!%p977_p8), [#allocation3], %s1051_s28 }
  0x46   : > { %s1057_s6 = scalar_lea.vmem (!%p977_p8), [#allocation2], %s568_s9 }
  0x47   : > { %858 = dma.done.wait (%p1142_p12), %s211_s5, 256  }
  0x48   : > { %860 = vsyncadd (%p1142_p12), %s211_s5, 4294967040  ;;  %p1143_p3 = scmp.ne.s32.totalorder %s1133_s20, 0 }
  0x4a   : > { %862 = dma.done.wait (%p1143_p3), [#allocation6], 2304  }
  0x4b   : > { %864 = vsyncadd (%p1143_p3), [#allocation6], 4294964992  ;;  %v708_v0 = vld [vmem:[#allocation5 + $0x78] sm:$0xff]   ;;  %v710_v2 = vld [vmem:[#allocation5 + $0x70] sm:$0xff]   ;;  %s244_s20 = scalar_lea.vmem [#allocation8], %s568_s9  ;;  %s596_s24 = sshll.u32 %s883_s15, 8 }
  0x4c   : > { %v709_v1 = vld [vmem:[#allocation5 + $0x38] sm:$0xff]   ;;  %597 = vmatprep.subr.bf16.mxu0 %v708_v0  ;;  %v711_v3 = vld [vmem:[#allocation5 + $0x30] sm:$0xff]   ;;  %v712_v4 = vld [vmem:[#allocation5 + $0x68] sm:$0xff]   ;;  %s450_s22 = sshll.u32 %s244_s20, 4  ;;  %s1077_s8 = scalar_lea.hbm %s1128_s3, %s596_s24  ;;  %s1072_s22 = int_to_ptr.vmem [resolvable:$true] %s450_s22 }
  0x4d   : > { %598 = vmatpush3.bf16.msra.mxu0 %v709_v1  ;;  %v713_v5 = vld [vmem:[#allocation5 + $0x28] sm:$0xff]   ;;  %v714_v6 = vld [vmem:[#allocation5 + $0x60] sm:$0xff]   ;;  %v716_v8 = vld [vmem:[#allocation5 + $0x58] sm:$0xff]   ;;  %s435_s11 = scalar_lea.sflag [#allocation4], %s1051_s28  ;;  %s807_s21 = scalar_lea.vmem %s1072_s22, 256 }
  0x4e   : > { %599 = vmatprep.subr.bf16.mxu0 %v710_v2  ;;  %v715_v7 = vld [vmem:[#allocation5 + $0x20] sm:$0xff]   ;;  %v717_v9 = vld [vmem:[#allocation5 + $0x18] sm:$0xff]   ;;  %v718_v10 = vld [vmem:[#allocation5 + $0x50] sm:$0xff]   ;;  %p808_p8 = scmp.ne.s32.totalorder %s1072_s22, %s807_s21  ;;  %s900_s15 = smov [#allocation8]  }
  0x4f   : > { %v726_v11 = vld [vmem:[%s1057_s6 + $0x4] ss:$8 sps:$4 sm:$0xff]   ;;  %v724_v17 = vld [vmem:[%s1057_s6] ss:$8 sps:$4 sm:$0xff]   ;;  %s811_s18 = sshll.u32 %s900_s15, 4  ;;  %s812_s18 = int_to_ptr.vmem [resolvable:$false] %s811_s18 }
  0x50   : > { %v719_v12 = vld [vmem:[#allocation5 + $0x10] sm:$0xff]   ;;  %423 = vmatprep.mubr.bf16.mxu0 %v726_v11  ;;  %v720_v13 = vld [vmem:[#allocation5 + $0x48] sm:$0xff]   ;;  %v722_v15 = vld [vmem:[#allocation5 + $0x40] sm:$0xff]   ;;  %p809_p9 = pnand %p808_p8, %p1021_p7  ;;  %s813_s27 = scalar_lea.vmem %s812_s18, 512 }
  0x51   : > { %600 = vmatpush3.bf16.msra.mxu0 %v711_v3  ;;  %v721_v14 = vld [vmem:[#allocation5 + $0x8] sm:$0xff]   ;;  %v723_v16 = vld [vmem:[#allocation5] sm:$0xff]   ;;  %p814_p2 = scmp.lt.s32.totalorder %s1072_s22, %s812_s18  ;;  %p815_p13 = scmp.lt.s32.totalorder %s813_s27, %s807_s21 }
  0x52   : > { %601 = vmatprep.subr.bf16.mxu0 %v712_v4  ;;  %v283_v19 = vld [vmem:[#allocation7] sm:$0xff]  ;;  %v284_v24 = vld [vmem:[#allocation7 + $0x8] sm:$0xff]  ;;  %p810_p11 = pneg %p809_p9 }
  0x53   : > { %p816_p0 = por %p815_p13, %p814_p2 }
  0x55   : > { %602 = vmatpush3.bf16.msra.mxu0 %v713_v5  ;;  %p817_p5 = pnand %p816_p0, %p810_p11 }
  0x56   : > { %603 = vmatprep.subr.bf16.mxu0 %v714_v6 }
  0x59   : > { %604 = vmatpush3.bf16.msra.mxu0 %v715_v7 }
  0x5a   : > { %605 = vmatprep.subr.bf16.mxu0 %v716_v8 }
  0x5d   : > { %606 = vmatpush3.bf16.msra.mxu0 %v717_v9 }
  0x5e   : > { %607 = vmatprep.subr.bf16.mxu0 %v718_v10 }
  0x61   : > { %608 = vmatpush3.bf16.msra.mxu0 %v719_v12 }
  0x62   : > { %609 = vmatprep.subr.bf16.mxu0 %v720_v13 }
  0x65   : > { %610 = vmatpush3.bf16.msra.mxu0 %v721_v14 }
  0x66   : > { %611 = vmatprep.subr.bf16.mxu0 %v722_v15 }
  0x69   : > { %612 = vmatpush3.bf16.msra.mxu0 %v723_v16 }
  0x6c   : > { %424 = vmatmul.mubr.bf16.vlgmr.msra.gmra.mxu0 %v724_v17 }
 0x12c   : > { %v613_v18 = vpop.f32.mrf.mxu0 }
 0x12e   : > { %v614_v20 = vpop.f32.mrf.mxu0 }
 0x12f   : > { %v615_v21 = vadd.f32 %v614_v20, %v613_v18 }
 0x130   : > { %v616_v22 = vpop.f32.mrf.mxu0 }
 0x131   : > { %v426_v23 = vadd.f32 %v615_v21, %v283_v19 }
 0x132   : > { %v617_v25 = vpop.f32.mrf.mxu0 }
 0x133   : > { %432 = vst [vmem:[%s244_s20] sm:$0xff] %v426_v23  ;;  %v618_v26 = vadd.f32 %v617_v25, %v616_v22 }
 0x135   : > { %v429_v27 = vadd.f32 %v618_v26, %v284_v24 }
 0x137   : > { %433 = vst [vmem:[%s244_s20 + $0x8] sm:$0xff] %v429_v27 }
 0x138   : > { %820 = shalt.err (!%p817_p5)
}
 0x139   : > { %s821_s25 = scalar_lea.hbm %s1077_s8, 256  ;;  %s825_s9 = scalar_lea.hbm %s1128_s3, 512 }
 0x13a   : > { %p822_p10 = scmp.ne.s32.totalorder %s1077_s8, %s821_s25  ;;  %p826_p6 = scmp.lt.s32.totalorder %s1077_s8, %s1128_s3 }
 0x13b   : > { %p827_p12 = scmp.lt.s32.totalorder %s825_s9, %s821_s25 }
 0x13c   : > { %p823_p1 = pnand %p822_p10, %p1021_p7 }
 0x13d   : > { %p828_p3 = por %p827_p12, %p826_p6 }
 0x13e   : > { %p824_p4 = pneg %p823_p1 }
 0x140   : > { %p829_p8 = pnand %p828_p3, %p824_p4 }
 0x142   : > { %832 = shalt.err (!%p829_p8)
}
 0x143   : > { %s901_s20 = smov 128   ;;  %s902_s24 = smov 8  }
 0x144   : > { %629 = dma.vmem_to_hbm [thread:$0]  (%p1021_p7), %s1072_s22, 256, %s1077_s8, %s435_s11, %s901_s20, %s901_s20, %s902_s24  }
 0x145 PF: > { %s465_s10 = sand.u32 1, %s871_s12   ;;  %p1144_p9 = scmp.ne.s32.totalorder %s1136_s23, 0 }
 0x146   : > { %p1145_p11 = scmp.ge.s32.totalorder %s891_s17, 2  ;;  %s466_s7 = scalar_lea.sflag [#allocation4], %s465_s10 }
 0x148   : > { %p643_p2 = pnand %p1145_p11, %p1144_p9 }
 0x14a   : > { %p644_p13 = pneg %p643_p2 }
 0x14c   : > { %866 = dma.done.wait (%p644_p13), %s466_s7, 256  }
 0x14d   : > { %868 = vsyncadd (%p644_p13), %s466_s7, 4294967040  ;;  %s20_s17 = sadd.s32 1, %s891_s17   ;;  %s1146_s12 = smov %s875_s13 }
 0x14e   : > { %p17_p0 = scmp.ge.s32.totalorder %s20_s17, 4   ;;  %s1147_s13 = smov %s879_s14 }
 0x14f   : > { %s1148_s14 = smov %s1030_s4  ;;  %s1149_s15 = smov %s887_s16 }
 0x150   : > { %s1150_s16 = smov %s1152_s19  ;;  %19 = sbr.rel (!%p17_p0) target bundleno = 7 (0x7), region = 86 }
 0x155   :  { %471 = vsyncpa [#allocation3], 1 }
 0x156   :  { %473 = vsyncpa [#allocation3 + $0x1], 1 }
 0x157   :  { %474 = vsyncpa [#allocation6], 1 }
 0x158   :  { %475 = vsyncpa [#allocation4], 1 }
 0x159   :  { %477 = vsyncpa [#allocation4 + $0x1], 1 }

</bundles_post_ra>
